<compile_context>
chip_gen: v7x
topology: tpu7x:2x2x1
jax: 0.10.0
libtpu: 0.0.40
codegen_flags: <defaults>
</compile_context>

<pallas_src>
import functools

import numpy as np
import jax
import jax.numpy as jnp
from jax.experimental import pallas as pl
from jax.experimental.pallas import tpu as pltpu


def _equal_params_split(out_ch, k):
    """Replicates the 'equal_params' channel split from MixConv2d.__init__."""
    groups = len(k)
    b = [out_ch] + [0] * groups
    a = np.eye(groups + 1, groups, k=-1)
    a -= np.roll(a, 1, axis=1)
    a *= np.array(k) ** 2
    a[0] = 1
    ch = np.linalg.lstsq(a, b, rcond=None)[0].round().astype(int)
    return [int(c) for c in ch]


def _fuse_weights_np(weights, biases, ks):
    """Zero-pad each group's (k,k,Cin,Co_g) HWIO weight to (kmax,kmax,Cin,Co_g),
    centered, and concatenate along Cout; concatenate biases.

    Only valid for stride=1, dilation=1, 'same' padding k//2 (checked by caller):
    a centered zero-padded kernel with padding kmax//2 then gives identical output.
    """
    kmax = max(ks)
    pmax = kmax // 2
    cin = int(weights[0].shape[2])
    parts = []
    for kk, w in zip(ks, weights):
        off = pmax - kk // 2
        wp = np.zeros((kmax, kmax, cin, int(w.shape[-1])), np.float32)
        wp[off:off + kk, off:off + kk] = np.asarray(w, np.float32)
        parts.append(wp)
    wf = np.concatenate(parts, axis=-1)                                # (kmax,kmax,Cin,Cout)
    bf = np.concatenate([np.asarray(b, np.float32).reshape(-1) for b in biases])
    return wf, bf


def _build_toeplitz_np(wf, W, row_width):
    """Expand fused HWIO weights into a single concatenated block-Toeplitz matrix.

    T[dy*row_width + wp*Cin + ci, w*Cout + co] = wf[dy, wp - w, ci, co]
        for 0 <= wp - w < kmax, else 0;  rows >= Wp*Cin within each dy block are 0.

    band(dy)[m, wp*Cin+ci] @ T  then performs the whole (dy, dx, Cin) contraction
    as one MXU matmul with a lane-dense (M, W*Cout) result.
    """
    kmax, _, cin, cout = wf.shape
    pmax = kmax // 2
    wpad = W + 2 * pmax
    assert row_width >= wpad * cin
    dx = np.arange(wpad)[:, None] - np.arange(W)[None, :]              # (Wp, W)
    valid = (dx >= 0) & (dx < kmax)
    g = wf[:, np.clip(dx, 0, kmax - 1), :, :]                          # (kmax, Wp, W, Cin, Cout)
    g = np.where(valid[None, :, :, None, None], g, 0.0)
    t = np.transpose(g, (0, 1, 3, 2, 4)).reshape(kmax, wpad * cin, W * cout)
    tp = np.zeros((kmax, row_width, W * cout), np.float32)
    tp[:, :wpad * cin, :] = t
    return tp.reshape(kmax * row_width, W * cout)


def _mixconv_kernel(xp_ref, t_ref, b_ref, o_ref, *, N, H, kmax, row_w):
    # xp_ref: (N, H+2p, row_w)          padded, lane-packed, lane-aligned input (f32)
    # t_ref : (kmax*row_w, W*Cout)      concatenated block-Toeplitz weights (compute dtype)
    # b_ref : (1, W*Cout)               bias tiled across W (f32)
    # o_ref : (N*H, W*Cout)             lane-dense output slab (f32)
    cd = t_ref.dtype
    x = xp_ref[...].astype(cd)                                  # cast hoisted: each row cast once
    bands = [x[:, dy:dy + H, :].reshape(N * H, row_w) for dy in range(kmax)]
    lhs = jnp.concatenate(bands, axis=-1)                       # (N*H, kmax*row_w), lane-aligned pieces
    acc = jnp.dot(lhs, t_ref[...], preferred_element_type=jnp.float32)   # single MXU matmul
    o_ref[...] = (acc + b_ref[...]).astype(o_ref.dtype)


def mixconv2d_init(weights, biases, ks, H, W, *, stride=1, dilation=1,
                   compute_dtype=jnp.bfloat16):
    """Precompute (once) the fused block-Toeplitz weights and tiled bias slab."""
    assert stride == 1 and dilation == 1, (
        "fused zero-pad-to-kmax form requires stride=1, dilation=1, 'same' padding")
    kmax = max(ks)
    pmax = kmax // 2
    cin = int(weights[0].shape[2])
    wpad = W + 2 * pmax
    row_w = max(128, ((wpad * cin + 127) // 128) * 128)          # lane-aligned packed row width
    wf, bf = _fuse_weights_np(weights, biases, ks)
    cout = int(wf.shape[-1])
    t = jnp.asarray(_build_toeplitz_np(wf, W, row_w), dtype=compute_dtype)
    bias_slab = jnp.asarray(np.tile(bf, W)[None, :], dtype=jnp.float32)  # (1, W*Cout)
    return dict(t=t, bias=bias_slab, kmax=kmax, pmax=pmax, cin=cin, cout=cout,
                H=H, W=W, row_w=row_w)


def mixconv2d_forward(x_nchw, params):
    """MixConv2d.forward == torch.cat([conv_k(x) for k in ks], dim=1), NCHW in/out."""
    N, Cin, H, W = x_nchw.shape
    assert Cin == params["cin"] and H == params["H"] and W == params["W"]
    kmax, pmax = params["kmax"], params["pmax"]
    cout, row_w = params["cout"], params["row_w"]
    Hp, Wp = H + 2 * pmax, W + 2 * pmax

    # Input prep: ONE transpose, ONE max-padding pad, lane-pack (W, Cin), lane-pad to row_w.
    xp = jnp.transpose(x_nchw, (0, 2, 3, 1)).astype(jnp.float32)
    xp = jnp.pad(xp, ((0, 0), (pmax, pmax), (pmax, pmax), (0, 0)))
    xp = xp.reshape(N, Hp, Wp * Cin)
    if row_w > Wp * Cin:
        xp = jnp.pad(xp, ((0, 0), (0, 0), (0, row_w - Wp * Cin)))

    out_slab = pl.pallas_call(
        functools.partial(_mixconv_kernel, N=N, H=H, kmax=kmax, row_w=row_w),
        out_shape=jax.ShapeDtypeStruct((N * H, W * cout), jnp.float32),
        grid=(1,),                                   # single step: batch folded into matmul M
        in_specs=[
            pl.BlockSpec((N, Hp, row_w), lambda i: (0, 0, 0)),
            pl.BlockSpec((kmax * row_w, W * cout), lambda i: (0, 0)),
            pl.BlockSpec((1, W * cout), lambda i: (0, 0)),
        ],
        out_specs=pl.BlockSpec((N * H, W * cout), lambda i: (0, 0)),
        compiler_params=pltpu.CompilerParams(dimension_semantics=("arbitrary",)),
    )(xp, params["t"], params["bias"])

    # Lane-dense slab -> NHWC -> NCHW (matches torch.cat([...], dim=1) channel order).
    return jnp.transpose(out_slab.reshape(N, H, W, cout), (0, 3, 1, 2))


def _reference_forward(x_nchw, weights, biases, ks):
    """Pure-JAX reference (lax conv, HIGHEST precision) for correctness check."""
    outs = []
    for kk, w, b in zip(ks, weights, biases):
        p = kk // 2
        y = jax.lax.conv_general_dilated(
            x_nchw.astype(jnp.float32), w,              # HWIO
            window_strides=(1, 1), padding=((p, p), (p, p)),
            dimension_numbers=("NCHW", "HWIO", "NCHW"),
            precision=jax.lax.Precision.HIGHEST,
        )
        outs.append(y + b.reshape(1, -1, 1, 1))
    return jnp.concatenate(outs, axis=1)


if __name__ == "__main__":
    # Module config
    in_ch, out_ch = 4, 16
    ks = (3, 5, 7)
    ch = _equal_params_split(out_ch, ks)          # 'equal_params' split -> [10, 4, 2]
    assert sum(ch) == out_ch

    # Deterministic synthetic parameters (HWIO weights, per-group bias).
    key = jax.random.PRNGKey(0)
    keys = jax.random.split(key, 2 * len(ks) + 1)
    weights, biases = [], []
    for g, kk in enumerate(ks):
        w = 0.1 * jax.random.normal(keys[2 * g], (kk, kk, in_ch, ch[g]), dtype=jnp.float32)
        b = 0.1 * jax.random.normal(keys[2 * g + 1], (1, ch[g]), dtype=jnp.float32)
        weights.append(w)
        biases.append(b)

    # Input (NCHW, like PyTorch)
    N, H, W = 2, 16, 16
    x = jax.random.normal(keys[-1], (N, in_ch, H, W), dtype=jnp.float32)

    y_ref = jax.block_until_ready(_reference_forward(x, weights, biases, ks))

    # Default: bf16 matmul operands (single-pass MXU + half the weight DMA on v5e/v6e/v7x).
    params = mixconv2d_init(weights, biases, ks, H, W, compute_dtype=jnp.bfloat16)
    fwd = jax.jit(lambda xx: mixconv2d_forward(xx, params))
    y = jax.block_until_ready(fwd(x))
    assert y.shape == (N, out_ch, H, W), y.shape
    np.testing.assert_allclose(np.asarray(y), np.asarray(y_ref), rtol=5e-2, atol=5e-2)

    # Tight-precision path: f32 operands (multi-pass MXU), near-PyTorch-float32 accuracy.
    params32 = mixconv2d_init(weights, biases, ks, H, W, compute_dtype=jnp.float32)
    fwd32 = jax.jit(lambda xx: mixconv2d_forward(xx, params32))
    y32 = jax.block_until_ready(fwd32(x))
    np.testing.assert_allclose(np.asarray(y32), np.asarray(y_ref), rtol=5e-4, atol=5e-4)

    print("KERNEL_OK")
</pallas_src>

<mosaic_0001>
module attributes {stable_mosaic.version = 11 : i64} {
  func.func @_mixconv_kernel(%arg0: i32, %arg1: memref<2x22x128xf32, #tpu.memory_space<vmem>>, %arg2: memref<896x256xbf16, #tpu.memory_space<vmem>>, %arg3: memref<1x256xf32, #tpu.memory_space<vmem>>, %arg4: memref<32x256xf32, #tpu.memory_space<vmem>>) attributes {dimension_semantics = [#tpu.dimension_semantics<arbitrary>], iteration_bounds = array<i64: 1>, scalar_prefetch = 0 : i64, scratch_operands = 0 : i64, tpu.core_type = #tpu.core_type<tc>, window_params = [{pipeline_mode = #tpu.pipeline_mode<synchronous>, transform_indices = @transform_0, window_bounds = array<i64: 2, 22, 128>}, {pipeline_mode = #tpu.pipeline_mode<synchronous>, transform_indices = @transform_1, window_bounds = array<i64: 896, 256>}, {pipeline_mode = #tpu.pipeline_mode<synchronous>, transform_indices = @transform_2, window_bounds = array<i64: 1, 256>}, {pipeline_mode = #tpu.pipeline_mode<synchronous>, transform_indices = @transform_3, window_bounds = array<i64: 32, 256>}]} {
    %c0 = arith.constant 0 : index
    %c0_0 = arith.constant 0 : index
    %c0_1 = arith.constant 0 : index
    %0 = vector.load %arg1[%c0, %c0_0, %c0_1] : memref<2x22x128xf32, #tpu.memory_space<vmem>>, vector<2x22x128xf32>
    %1 = arith.truncf %0 : vector<2x22x128xf32> to vector<2x22x128xbf16>
    %2 = vector.extract_strided_slice %1 {offsets = [0, 0, 0], sizes = [2, 16, 128], strides = [1, 1, 1]} : vector<2x22x128xbf16> to vector<2x16x128xbf16>
    %3 = vector.shape_cast %2 : vector<2x16x128xbf16> to vector<32x128xbf16>
    %4 = vector.extract_strided_slice %1 {offsets = [0, 1, 0], sizes = [2, 16, 128], strides = [1, 1, 1]} : vector<2x22x128xbf16> to vector<2x16x128xbf16>
    %5 = vector.shape_cast %4 : vector<2x16x128xbf16> to vector<32x128xbf16>
    %6 = vector.extract_strided_slice %1 {offsets = [0, 2, 0], sizes = [2, 16, 128], strides = [1, 1, 1]} : vector<2x22x128xbf16> to vector<2x16x128xbf16>
    %7 = vector.shape_cast %6 : vector<2x16x128xbf16> to vector<32x128xbf16>
    %8 = vector.extract_strided_slice %1 {offsets = [0, 3, 0], sizes = [2, 16, 128], strides = [1, 1, 1]} : vector<2x22x128xbf16> to vector<2x16x128xbf16>
    %9 = vector.shape_cast %8 : vector<2x16x128xbf16> to vector<32x128xbf16>
    %10 = vector.extract_strided_slice %1 {offsets = [0, 4, 0], sizes = [2, 16, 128], strides = [1, 1, 1]} : vector<2x22x128xbf16> to vector<2x16x128xbf16>
    %11 = vector.shape_cast %10 : vector<2x16x128xbf16> to vector<32x128xbf16>
    %12 = vector.extract_strided_slice %1 {offsets = [0, 5, 0], sizes = [2, 16, 128], strides = [1, 1, 1]} : vector<2x22x128xbf16> to vector<2x16x128xbf16>
    %13 = vector.shape_cast %12 : vector<2x16x128xbf16> to vector<32x128xbf16>
    %14 = vector.extract_strided_slice %1 {offsets = [0, 6, 0], sizes = [2, 16, 128], strides = [1, 1, 1]} : vector<2x22x128xbf16> to vector<2x16x128xbf16>
    %15 = vector.shape_cast %14 : vector<2x16x128xbf16> to vector<32x128xbf16>
    %16 = tpu.concatenate %3, %5, %7, %9, %11, %13, %15 in 1 : vector<32x128xbf16>, vector<32x128xbf16>, vector<32x128xbf16>, vector<32x128xbf16>, vector<32x128xbf16>, vector<32x128xbf16>, vector<32x128xbf16> -> vector<32x896xbf16>
    %c0_2 = arith.constant 0 : index
    %c0_3 = arith.constant 0 : index
    %17 = vector.load %arg2[%c0_2, %c0_3] : memref<896x256xbf16, #tpu.memory_space<vmem>>, vector<896x256xbf16>
    %cst = arith.constant dense<0.000000e+00> : vector<32x256xf32>
    %18 = tpu.matmul %16, %17, %cst {dimension_numbers = #tpu.dot_dimension_numbers<[1], [0], [0], [1], [0, 0, 1, 1], [], []>} : vector<32x896xbf16>, vector<896x256xbf16>, vector<32x256xf32> -> vector<32x256xf32>
    %c0_4 = arith.constant 0 : index
    %c0_5 = arith.constant 0 : index
    %19 = vector.load %arg3[%c0_4, %c0_5] : memref<1x256xf32, #tpu.memory_space<vmem>>, vector<1x256xf32>
    %20 = vector.broadcast %19 : vector<1x256xf32> to vector<32x256xf32>
    %21 = arith.addf %18, %20 : vector<32x256xf32>
    %c0_6 = arith.constant 0 : index
    %c0_7 = arith.constant 0 : index
    %22 = vector.load %arg4[%c0_6, %c0_7] : memref<32x256xf32, #tpu.memory_space<vmem>>, vector<32x256xf32>
    tpu.vector_store %arg4[%c0_6, %c0_7], %21 {strides = array<i32>} : memref<32x256xf32, #tpu.memory_space<vmem>>, vector<32x256xf32>,
    return
  }
  func.func @transform_0(%arg0: i32) -> (i32, i32, i32) {
    %c0_i32 = arith.constant 0 : i32
    %c0_i32_0 = arith.constant 0 : i32
    %c0_i32_1 = arith.constant 0 : i32
    %c0_i32_2 = arith.constant 0 : i32
    return %c0_i32, %c0_i32_0, %c0_i32_1 : i32, i32, i32
  }
  func.func @transform_1(%arg0: i32) -> (i32, i32) {
    %c0_i32 = arith.constant 0 : i32
    %c0_i32_0 = arith.constant 0 : i32
    %c0_i32_1 = arith.constant 0 : i32
    return %c0_i32, %c0_i32_0 : i32, i32
  }
  func.func @transform_2(%arg0: i32) -> (i32, i32) {
    %c0_i32 = arith.constant 0 : i32
    %c0_i32_0 = arith.constant 0 : i32
    %c0_i32_1 = arith.constant 0 : i32
    return %c0_i32, %c0_i32_0 : i32, i32
  }
  func.func @transform_3(%arg0: i32) -> (i32, i32) {
    %c0_i32 = arith.constant 0 : i32
    %c0_i32_0 = arith.constant 0 : i32
    %c0_i32_1 = arith.constant 0 : i32
    return %c0_i32, %c0_i32_0 : i32, i32
  }
}

</mosaic_0001>

<bundles_post_ra>
// kernel: _lambda_.1
= control target key start
LH: loop header
LB: loop body
LE: loop exit
PB: predicated region body
PF: predicated region fallthrough
CT: control target
= control target key end

     0   :  { %vm25_vm0 = vsmask.f32 7424  ;;  %vm95_vm1 = vsmask.f32 5376  ;;  %vm56_vm2 = vcmask 1046528   ;;  %vm86_vm3 = vcmask 1045504   ;;  %s1830_s1 = inlined_call_operand.vmem [shape: bf16[896,256], index: 1, kind: input, shape index: {}]   ;;  %s1831_s0 = inlined_call_operand.vmem [shape: f32[2,22,128], index: 0, kind: input, shape index: {}]   ;;  %s1832_s2 = inlined_call_operand.vmem [shape: f32[1,256], index: 2, kind: input, shape index: {}]   ;;  %s1833_s3 = inlined_call_operand.vmem [shape: f32[32,256], index: 3, kind: output, shape index: {}]  }
   0x1   :  { %v1174_v0 = vld [vmem:[%s1830_s1 + $0x4] ss:$8 sps:$4 sm:$0xff]   ;;  %v1178_v2 = vld [vmem:[%s1830_s1] ss:$8 sps:$4 sm:$0xff]   ;;  %v1180_v4 = vld [vmem:[%s1830_s1 + $0x14] ss:$8 sps:$4 sm:$0xff]  }
   0x2   :  { %v1176_v1 = vld [vmem:[%s1830_s1 + $0x204] ss:$8 sps:$4 sm:$0xff]   ;;  %805 = vmatprep.subr.bf16.mxu1 %v1174_v0  ;;  %v1179_v3 = vld [vmem:[%s1830_s1 + $0x200] ss:$8 sps:$4 sm:$0xff]   ;;  %v1182_v5 = vld [vmem:[%s1830_s1 + $0x214] ss:$8 sps:$4 sm:$0xff]  }
   0x3   :  { %911 = vmatprep.subr.bf16.mxu0 %v1176_v1  ;;  %806 = vmatpush1.bf16.msra.mxu1 %v1178_v2  ;;  %v1184_v6 = vld [vmem:[%s1830_s1 + $0x10] ss:$8 sps:$4 sm:$0xff]   ;;  %v1186_v8 = vld [vmem:[%s1830_s1 + $0x24] ss:$8 sps:$4 sm:$0xff]   ;;  %v1190_v10 = vld [vmem:[%s1830_s1 + $0x20] ss:$8 sps:$4 sm:$0xff]  }
   0x4   :  { %912 = vmatpush1.bf16.msra.mxu0 %v1179_v3  ;;  %807 = vmatprep.subr.bf16.mxu1 %v1180_v4  ;;  %v1185_v7 = vld [vmem:[%s1830_s1 + $0x210] ss:$8 sps:$4 sm:$0xff]   ;;  %v1188_v9 = vld [vmem:[%s1830_s1 + $0x224] ss:$8 sps:$4 sm:$0xff]   ;;  %v1191_v11 = vld [vmem:[%s1830_s1 + $0x220] ss:$8 sps:$4 sm:$0xff]  }
   0x5   :  { %913 = vmatprep.subr.bf16.mxu0 %v1182_v5  ;;  %v1192_v12 = vld [vmem:[%s1830_s1 + $0x34] ss:$8 sps:$4 sm:$0xff]   ;;  %v1196_v14 = vld [vmem:[%s1830_s1 + $0x30] ss:$8 sps:$4 sm:$0xff]   ;;  %v1198_v16 = vld [vmem:[%s1830_s1 + $0x44] ss:$8 sps:$4 sm:$0xff]  }
   0x6   :  { %v1194_v13 = vld [vmem:[%s1830_s1 + $0x234] ss:$8 sps:$4 sm:$0xff]   ;;  %v1197_v15 = vld [vmem:[%s1830_s1 + $0x230] ss:$8 sps:$4 sm:$0xff]   ;;  %v1200_v17 = vld [vmem:[%s1830_s1 + $0x244] ss:$8 sps:$4 sm:$0xff]  }
   0x7   :  { %808 = vmatpush1.bf16.msra.mxu1 %v1184_v6  ;;  %v1202_v18 = vld [vmem:[%s1830_s1 + $0x40] ss:$8 sps:$4 sm:$0xff]   ;;  %v1204_v20 = vld [vmem:[%s1830_s1 + $0x54] ss:$8 sps:$4 sm:$0xff]   ;;  %v1208_v22 = vld [vmem:[%s1830_s1 + $0x50] ss:$8 sps:$4 sm:$0xff]  }
   0x8   :  { %914 = vmatpush1.bf16.msra.mxu0 %v1185_v7  ;;  %809 = vmatprep.subr.bf16.mxu1 %v1186_v8  ;;  %v1203_v19 = vld [vmem:[%s1830_s1 + $0x240] ss:$8 sps:$4 sm:$0xff]   ;;  %v1206_v21 = vld [vmem:[%s1830_s1 + $0x254] ss:$8 sps:$4 sm:$0xff]   ;;  %v1209_v23 = vld [vmem:[%s1830_s1 + $0x250] ss:$8 sps:$4 sm:$0xff]  }
   0x9   :  { %915 = vmatprep.subr.bf16.mxu0 %v1188_v9  ;;  %v1210_v24 = vld [vmem:[%s1830_s1 + $0x64] ss:$8 sps:$4 sm:$0xff]   ;;  %v1214_v26 = vld [vmem:[%s1830_s1 + $0x60] ss:$8 sps:$4 sm:$0xff]   ;;  %v1216_v28 = vld [vmem:[%s1830_s1 + $0x74] ss:$8 sps:$4 sm:$0xff]  }
   0xa   :  { %v1212_v25 = vld [vmem:[%s1830_s1 + $0x264] ss:$8 sps:$4 sm:$0xff]   ;;  %v1215_v27 = vld [vmem:[%s1830_s1 + $0x260] ss:$8 sps:$4 sm:$0xff]   ;;  %v1218_v29 = vld [vmem:[%s1830_s1 + $0x274] ss:$8 sps:$4 sm:$0xff]  }
   0xb   :  { %810 = vmatpush1.bf16.msra.mxu1 %v1190_v10  ;;  %v1220_v30 = vld [vmem:[%s1830_s1 + $0x70] ss:$8 sps:$4 sm:$0xff]   ;;  %v1222_v32 = vld [vmem:[%s1830_s1 + $0x84] ss:$8 sps:$4 sm:$0xff]   ;;  %v1226_v34 = vld [vmem:[%s1830_s1 + $0x80] ss:$8 sps:$4 sm:$0xff]  }
   0xc   :  { %916 = vmatpush1.bf16.msra.mxu0 %v1191_v11  ;;  %811 = vmatprep.subr.bf16.mxu1 %v1192_v12  ;;  %v1221_v31 = vld [vmem:[%s1830_s1 + $0x270] ss:$8 sps:$4 sm:$0xff]   ;;  %v1224_v33 = vld [vmem:[%s1830_s1 + $0x284] ss:$8 sps:$4 sm:$0xff]   ;;  %v1227_v35 = vld [vmem:[%s1830_s1 + $0x280] ss:$8 sps:$4 sm:$0xff]  }
   0xd   :  { %917 = vmatprep.subr.bf16.mxu0 %v1194_v13  ;;  %v1228_v36 = vld [vmem:[%s1830_s1 + $0x94] ss:$8 sps:$4 sm:$0xff]   ;;  %v1232_v38 = vld [vmem:[%s1830_s1 + $0x90] ss:$8 sps:$4 sm:$0xff]   ;;  %v1234_v40 = vld [vmem:[%s1830_s1 + $0xa4] ss:$8 sps:$4 sm:$0xff]  }
   0xe   :  { %v1230_v37 = vld [vmem:[%s1830_s1 + $0x294] ss:$8 sps:$4 sm:$0xff]   ;;  %v1233_v39 = vld [vmem:[%s1830_s1 + $0x290] ss:$8 sps:$4 sm:$0xff]   ;;  %v1236_v41 = vld [vmem:[%s1830_s1 + $0x2a4] ss:$8 sps:$4 sm:$0xff]  }
   0xf   :  { %812 = vmatpush1.bf16.msra.mxu1 %v1196_v14  ;;  %v1238_v42 = vld [vmem:[%s1830_s1 + $0xa0] ss:$8 sps:$4 sm:$0xff]   ;;  %v1240_v44 = vld [vmem:[%s1830_s1 + $0xb4] ss:$8 sps:$4 sm:$0xff]   ;;  %v1244_v46 = vld [vmem:[%s1830_s1 + $0xb0] ss:$8 sps:$4 sm:$0xff]  }
  0x10   :  { %918 = vmatpush1.bf16.msra.mxu0 %v1197_v15  ;;  %813 = vmatprep.subr.bf16.mxu1 %v1198_v16  ;;  %v1239_v43 = vld [vmem:[%s1830_s1 + $0x2a0] ss:$8 sps:$4 sm:$0xff]   ;;  %v1242_v45 = vld [vmem:[%s1830_s1 + $0x2b4] ss:$8 sps:$4 sm:$0xff]   ;;  %v1245_v50 = vld [vmem:[%s1830_s1 + $0x2b0] ss:$8 sps:$4 sm:$0xff]  }
  0x11   :  { %919 = vmatprep.subr.bf16.mxu0 %v1200_v17  ;;  %v15_v47 = vld [vmem:[%s1831_s0] sm:$0xff]  ;;  %v16_v48 = vld [vmem:[%s1831_s0 + $0x8] sm:$0xff]  ;;  %v17_v49 = vld [vmem:[%s1831_s0 + $0x10] sm:$0x3f]  ;;  %vm65_vm4 = vsmask.f32 6400 }
  0x12   :  { %v1246_v51 = vld [vmem:[%s1830_s1 + $0xc4] ss:$8 sps:$4 sm:$0xff]   ;;  %v1519_v52 = vpack.c.bf16 %v16_v48, %v15_v47  ;;  %v1521_v53 = vpack.c.bf16 %v17_v49, %v17_v49  ;;  %v1250_v55 = vld [vmem:[%s1830_s1 + $0xc0] ss:$8 sps:$4 sm:$0xff]   ;;  %v1252_v61 = vld [vmem:[%s1830_s1 + $0xd4] ss:$8 sps:$4 sm:$0xff]  }
  0x13   :  { %814 = vmatpush1.bf16.msra.mxu1 %v1202_v18  ;;  %v1248_v54 = vld [vmem:[%s1830_s1 + $0x2c4] ss:$8 sps:$4 sm:$0xff]   ;;  %v1251_v60 = vld [vmem:[%s1830_s1 + $0x2c0] ss:$8 sps:$4 sm:$0xff]   ;;  %v1254_v2 = vld [vmem:[%s1830_s1 + $0x2d4] ss:$8 sps:$4 sm:$0xff]  }
  0x14   :  { %920 = vmatpush1.bf16.msra.mxu0 %v1203_v19  ;;  %815 = vmatprep.subr.bf16.mxu1 %v1204_v20  ;;  %v1530_v56 = vshrl.u32 %v1519_v52, 16  ;;  %v1533_v57 = vshll.u32 %v1519_v52, 16  ;;  %v1536_v58 = vshll.u32 %v1521_v53, 16  ;;  %v69_v59 = vshrl.u32 %v1521_v53, 16  ;;  %v1256_v7 = vld [vmem:[%s1830_s1 + $0xd0] ss:$8 sps:$4 sm:$0xff]  }
  0x15   :  { %921 = vmatprep.subr.bf16.mxu0 %v1206_v21  ;;  %v1257_v9 = vld [vmem:[%s1830_s1 + $0x2d0] ss:$8 sps:$4 sm:$0xff]   ;;  %v1258_v10 = vld [vmem:[%s1830_s1 + $0xe4] ss:$8 sps:$4 sm:$0xff]   ;;  %v57_v14 = vrot.slane %v1519_v52, 1  ;;  %v58_v15 = vrot.slane %v1521_v53, 1 }
  0x16   :  { %v31_v62 = vrot.slane %v1533_v57, 1  ;;  %v36_v63 = vrot.slane %v1536_v58, 1  ;;  %v96_v0 = vrot.slane %v1530_v56, 2  ;;  %v97_v1 = vrot.slane %v1533_v57, 3  ;;  %v1260_v12 = vld [vmem:[%s1830_s1 + $0x2e4] ss:$8 sps:$4 sm:$0xff]  }
  0x17   :  { %816 = vmatpush1.bf16.msra.mxu1 %v1208_v22  ;;  %v99_v3 = vrot.slane %v69_v59, 2  ;;  %v100_v4 = vrot.slane %v1536_v58, 3  ;;  %v1262_v16 = vld [vmem:[%s1830_s1 + $0xe0] ss:$8 sps:$4 sm:$0xff]   ;;  %v1264_v18 = vld [vmem:[%s1830_s1 + $0xf4] ss:$8 sps:$4 sm:$0xff]   ;;  %v1582_v19 = vsel %vm56_vm2, %v57_v14, %v58_v15 }
  0x18   :  { %922 = vmatpush1.bf16.msra.mxu0 %v1209_v23  ;;  %817 = vmatprep.subr.bf16.mxu1 %v1210_v24  ;;  %v32_v5 = vor.u32 %v31_v62, %v1530_v56  ;;  %v98_v6 = vor.u32 %v97_v1, %v96_v0  ;;  %v1263_v17 = vld [vmem:[%s1830_s1 + $0x2e0] ss:$8 sps:$4 sm:$0xff]   ;;  %v1266_v20 = vld [vmem:[%s1830_s1 + $0x2f4] ss:$8 sps:$4 sm:$0xff]   ;;  %v1268_v21 = vld [vmem:[%s1830_s1 + $0xf0] ss:$8 sps:$4 sm:$0xff]  }
  0x19   :  { %923 = vmatprep.subr.bf16.mxu0 %v1212_v25  ;;  %v101_v8 = vor.u32 %v100_v4, %v99_v3  ;;  %v1269_v22 = vld [vmem:[%s1830_s1 + $0x2f0] ss:$8 sps:$4 sm:$0xff]   ;;  %v87_v23 = vrot.slane %v1519_v52, 2  ;;  %v88_v24 = vrot.slane %v1521_v53, 2  ;;  %v1272_v25 = vld [vmem:[%s1830_s1 + $0x104] ss:$8 sps:$4 sm:$0xff]  }
  0x1a   :  { %v37_v11 = vsel %vm25_vm0, %v32_v5, %v36_v63  ;;  %v1285_v3 = vld [vmem:[%s1830_s1 + $0x320] ss:$8 sps:$4 sm:$0xff]   ;;  %v1299_v14 = vld [vmem:[%s1830_s1 + $0x344] ss:$8 sps:$4 sm:$0xff]   ;;  %v1342_v15 = vmov 0   ;;  %vm112_vm5 = vcmask 1044480  }
  0x1b   :  { %818 = vmatpush1.bf16.msra.mxu1 %v1214_v26  ;;  %v102_v13 = vsel %vm95_vm1, %v98_v6, %v101_v8  ;;  %837 = vmatprep.mubr.bf16.mxu1 %v37_v11  ;;  %v1275_v26 = vld [vmem:[%s1830_s1 + $0x304] ss:$8 sps:$4 sm:$0xff]   ;;  %v1290_v6 = vld [vmem:[%s1830_s1 + $0x134] ss:$8 sps:$4 sm:$0xff]   ;;  %v1288_v11 = vld [vmem:[%s1830_s1 + $0x130] ss:$8 sps:$4 sm:$0xff]  }
  0x1c   :  { %924 = vmatpush1.bf16.msra.mxu0 %v1215_v27  ;;  %819 = vmatprep.subr.bf16.mxu1 %v1216_v28  ;;  %v18_v27 = vld [vmem:[%s1831_s0 + $0x18] sm:$0xff]  ;;  %v19_v28 = vld [vmem:[%s1831_s0 + $0x20] sm:$0xff] }
  0x1d   :  { %925 = vmatprep.subr.bf16.mxu0 %v1218_v29  ;;  %943 = vmatprep.mubr.bf16.mxu0 %v102_v13  ;;  %v20_v29 = vld [vmem:[%s1831_s0 + $0x28] sm:$0x3f] }
  0x1e   :  { %v1296_v13 = vld [vmem:[%s1830_s1 + $0x144] ss:$8 sps:$4 sm:$0xff]  }
  0x1f   :  { %820 = vmatpush1.bf16.msra.mxu1 %v1220_v30  ;;  %v1270_v30 = vld [vmem:[%s1830_s1 + $0x100] ss:$8 sps:$4 sm:$0xff]  }
  0x20   :  { %926 = vmatpush1.bf16.msra.mxu0 %v1221_v31  ;;  %821 = vmatprep.subr.bf16.mxu1 %v1222_v32  ;;  %v1613_v31 = vpack.c.bf16 %v19_v28, %v18_v27  ;;  %v1615_v32 = vpack.c.bf16 %v20_v29, %v20_v29  ;;  %v1314_v27 = vld [vmem:[%s1830_s1 + $0x174] ss:$8 sps:$4 sm:$0xff]   ;;  %v1312_v29 = vld [vmem:[%s1830_s1 + $0x170] ss:$8 sps:$4 sm:$0xff]  }
  0x21   :  { %927 = vmatprep.subr.bf16.mxu0 %v1224_v33  ;;  %v1273_v33 = vld [vmem:[%s1830_s1 + $0x300] ss:$8 sps:$4 sm:$0xff]   ;;  %v1317_v28 = vld [vmem:[%s1830_s1 + $0x374] ss:$8 sps:$4 sm:$0xff]  }
  0x22   :  { %v60_v5 = vrot.slane %v1613_v31, 1  ;;  %v61_v8 = vrot.slane %v1615_v32, 1 }
  0x23   :  { %822 = vmatpush1.bf16.msra.mxu1 %v1226_v34  ;;  %v89_v34 = vsel %vm86_vm3, %v87_v23, %v88_v24  ;;  %v1308_v23 = vld [vmem:[%s1830_s1 + $0x164] ss:$8 sps:$4 sm:$0xff]  }
  0x24   :  { %928 = vmatpush1.bf16.msra.mxu0 %v1227_v35  ;;  %823 = vmatprep.subr.bf16.mxu1 %v1228_v36  ;;  %v1278_v35 = vld [vmem:[%s1830_s1 + $0x114] ss:$8 sps:$4 sm:$0xff]   ;;  %v1625_v36 = vshrl.u32 %v1613_v31, 16  ;;  %v1311_v24 = vld [vmem:[%s1830_s1 + $0x364] ss:$8 sps:$4 sm:$0xff]  }
  0x25   :  { %929 = vmatprep.subr.bf16.mxu0 %v1230_v37  ;;  %v1628_v37 = vshll.u32 %v1613_v31, 16 }
  0x27   :  { %824 = vmatpush1.bf16.msra.mxu1 %v1232_v38  ;;  %v1631_v38 = vshll.u32 %v1615_v32, 16  ;;  %v43_v48 = vrot.slane %v1628_v37, 1 }
  0x28   :  { %930 = vmatpush1.bf16.msra.mxu0 %v1233_v39  ;;  %825 = vmatprep.subr.bf16.mxu1 %v1234_v40  ;;  %v78_v39 = vshrl.u32 %v1615_v32, 16  ;;  %v1281_v40 = vld [vmem:[%s1830_s1 + $0x314] ss:$8 sps:$4 sm:$0xff]  }
  0x29   :  { %931 = vmatprep.subr.bf16.mxu0 %v1236_v41  ;;  %v66_v41 = vrot.slane %v1530_v56, 1  ;;  %v107_v47 = vrot.slane %v1631_v38, 3  ;;  %v48_v49 = vrot.slane %v1631_v38, 1 }
  0x2b   :  { %826 = vmatpush1.bf16.msra.mxu1 %v1238_v42  ;;  %v67_v42 = vrot.slane %v1533_v57, 2  ;;  %v90_v57 = vrot.slane %v1613_v31, 2 }
  0x2c   :  { %932 = vmatpush1.bf16.msra.mxu0 %v1239_v43  ;;  %827 = vmatprep.subr.bf16.mxu1 %v1240_v44  ;;  %v1276_v43 = vld [vmem:[%s1830_s1 + $0x110] ss:$8 sps:$4 sm:$0xff]   ;;  %v103_v44 = vrot.slane %v1625_v36, 2 }
  0x2d   :  { %933 = vmatprep.subr.bf16.mxu0 %v1242_v45  ;;  %v104_v45 = vrot.slane %v1628_v37, 3  ;;  %v68_v0 = vor.u32 %v67_v42, %v66_v41  ;;  %v116_v42 = vrot.slane %v1613_v31, 3 }
  0x2f   :  { %828 = vmatpush1.bf16.msra.mxu1 %v1244_v46  ;;  %v106_v46 = vrot.slane %v78_v39, 2 }
  0x30   :  { %934 = vmatpush1.bf16.msra.mxu0 %v1245_v50  ;;  %829 = vmatprep.subr.bf16.mxu1 %v1246_v51  ;;  %v71_v50 = vrot.slane %v69_v59, 1  ;;  %v72_v51 = vrot.slane %v1536_v58, 2  ;;  %v1284_v59 = vld [vmem:[%s1830_s1 + $0x124] ss:$8 sps:$4 sm:$0xff]  }
  0x31   :  { %935 = vmatprep.subr.bf16.mxu0 %v1248_v54  ;;  %v1279_v54 = vld [vmem:[%s1830_s1 + $0x310] ss:$8 sps:$4 sm:$0xff]   ;;  %v108_v56 = vor.u32 %v107_v47, %v106_v46  ;;  %v1287_v58 = vld [vmem:[%s1830_s1 + $0x324] ss:$8 sps:$4 sm:$0xff]   ;;  %v1329_v47 = vld [vmem:[%s1830_s1 + $0x1b4] ss:$8 sps:$4 sm:$0xff]  }
  0x32   :  { %v73_v1 = vor.u32 %v72_v51, %v71_v50  ;;  %v1335_v50 = vld [vmem:[%s1830_s1 + $0x1d4] ss:$8 sps:$4 sm:$0xff]   ;;  %v1333_v51 = vld [vmem:[%s1830_s1 + $0x1d0] ss:$8 sps:$4 sm:$0xff]  }
  0x33   :  { %830 = vmatpush1.bf16.msra.mxu1 %v1250_v55  ;;  %v105_v55 = vor.u32 %v104_v45, %v103_v44  ;;  %v1326_v44 = vld [vmem:[%s1830_s1 + $0x1a4] ss:$8 sps:$4 sm:$0xff]   ;;  %v1324_v45 = vld [vmem:[%s1830_s1 + $0x1a0] ss:$8 sps:$4 sm:$0xff]  }
  0x34   :  { %936 = vmatpush1.bf16.msra.mxu0 %v1251_v60  ;;  %831 = vmatprep.subr.bf16.mxu1 %v1252_v61  ;;  %v91_v60 = vrot.slane %v1615_v32, 2  ;;  %v44_v61 = vor.u32 %v43_v48, %v1625_v36  ;;  %v1332_v48 = vld [vmem:[%s1830_s1 + $0x1c4] ss:$8 sps:$4 sm:$0xff]  }
  0x35   :  { %937 = vmatprep.subr.bf16.mxu0 %v1254_v2  ;;  %v109_v62 = vsel %vm95_vm1, %v105_v55, %v108_v56  ;;  %v1282_v2 = vld [vmem:[%s1830_s1 + $0x120] ss:$8 sps:$4 sm:$0xff]   ;;  %v1341_v56 = vld [vmem:[%s1830_s1 + $0x1f4] ss:$8 sps:$4 sm:$0xff]  }
  0x36   :  { %v49_v63 = vsel %vm25_vm0, %v44_v61, %v48_v49  ;;  %v92_v4 = vsel %vm86_vm3, %v90_v57, %v91_v60  ;;  %v1330_v49 = vld [vmem:[%s1830_s1 + $0x1c0] ss:$8 sps:$4 sm:$0xff]   ;;  %v75_v57 = vrot.slane %v1625_v36, 1  ;;  %v76_v60 = vrot.slane %v1628_v37, 2  ;;  %v1339_v61 = vld [vmem:[%s1830_s1 + $0x1f0] ss:$8 sps:$4 sm:$0xff]  }
  0x37   :  { %832 = vmatpush1.bf16.msra.mxu1 %v1256_v7  ;;  %v1293_v7 = vld [vmem:[%s1830_s1 + $0x334] ss:$8 sps:$4 sm:$0xff]   ;;  %v1336_v55 = vld [vmem:[%s1830_s1 + $0x1e0] ss:$8 sps:$4 sm:$0xff]  }
  0x38   :  { %938 = vmatpush1.bf16.msra.mxu0 %v1257_v9  ;;  %833 = vmatprep.subr.bf16.mxu1 %v1258_v10  ;;  %v74_v9 = vsel %vm65_vm4, %v68_v0, %v73_v1  ;;  %v1685_v10 = vsel %vm56_vm2, %v60_v5, %v61_v8 }
  0x39   :  { %939 = vmatprep.subr.bf16.mxu0 %v1260_v12  ;;  %v1291_v12 = vld [vmem:[%s1830_s1 + $0x330] ss:$8 sps:$4 sm:$0xff]  }
  0x3b   :  { %834 = vmatpush1.bf16.msra.mxu1 %v1262_v16  ;;  %v1294_v16 = vld [vmem:[%s1830_s1 + $0x140] ss:$8 sps:$4 sm:$0xff]  }
  0x3c   :  { %940 = vmatpush1.bf16.msra.mxu0 %v1263_v17  ;;  %835 = vmatprep.subr.bf16.mxu1 %v1264_v18  ;;  %v1297_v17 = vld [vmem:[%s1830_s1 + $0x340] ss:$8 sps:$4 sm:$0xff]   ;;  %v1302_v18 = vld [vmem:[%s1830_s1 + $0x154] ss:$8 sps:$4 sm:$0xff]  }
  0x3d   :  { %941 = vmatprep.subr.bf16.mxu0 %v1266_v20  ;;  %v1305_v20 = vld [vmem:[%s1830_s1 + $0x354] ss:$8 sps:$4 sm:$0xff]  }
  0x3f   :  { %836 = vmatpush1.bf16.msra.mxu1 %v1268_v21  ;;  %v1300_v21 = vld [vmem:[%s1830_s1 + $0x150] ss:$8 sps:$4 sm:$0xff]  }
  0x40   :  { %942 = vmatpush1.bf16.msra.mxu0 %v1269_v22  ;;  %858 = vmatprep.subr.bf16.mxu1 %v1272_v25  ;;  %v1303_v22 = vld [vmem:[%s1830_s1 + $0x350] ss:$8 sps:$4 sm:$0xff]   ;;  %v1306_v25 = vld [vmem:[%s1830_s1 + $0x160] ss:$8 sps:$4 sm:$0xff]  }
  0x41   :  { %964 = vmatprep.subr.bf16.mxu0 %v1275_v26  ;;  %v1309_v26 = vld [vmem:[%s1830_s1 + $0x360] ss:$8 sps:$4 sm:$0xff]  }
  0x42   :  { %838 = vmatmul.mubr.bf16.vlgmr.msra.gmra.mrb[0].mxu1 %v1519_v52 }
  0x43   :  { %944 = vmatmul.mubr.bf16.vlgmr.msra.gmra.mrb[0].mxu0 %v89_v34  ;;  %859 = vmatpush1.bf16.msra.mxu1 %v1270_v30  ;;  %v1315_v30 = vld [vmem:[%s1830_s1 + $0x370] ss:$8 sps:$4 sm:$0xff]   ;;  %v114_v34 = vrot.slane %v1521_v53, 3 }
  0x44   :  { %965 = vmatpush1.bf16.msra.mxu0 %v1273_v33  ;;  %860 = vmatprep.subr.bf16.mxu1 %v1278_v35  ;;  %v113_v33 = vrot.slane %v1519_v52, 3  ;;  %v1320_v35 = vld [vmem:[%s1830_s1 + $0x184] ss:$8 sps:$4 sm:$0xff]   ;;  %v1323_v52 = vld [vmem:[%s1830_s1 + $0x194] ss:$8 sps:$4 sm:$0xff]  }
  0x45   :  { %966 = vmatprep.subr.bf16.mxu0 %v1281_v40  ;;  %953 = vmatprep.mubr.bf16.mxu0 %v109_v62  ;;  %v1318_v40 = vld [vmem:[%s1830_s1 + $0x180] ss:$8 sps:$4 sm:$0xff]   ;;  %v1321_v53 = vld [vmem:[%s1830_s1 + $0x190] ss:$8 sps:$4 sm:$0xff]   ;;  %v77_v62 = vor.u32 %v76_v60, %v75_v57 }
  0x46   :  { %847 = vmatprep.mubr.bf16.mxu1 %v49_v63  ;;  %v115_v41 = vsel %vm112_vm5, %v113_v33, %v114_v34 }
  0x47   :  { %861 = vmatpush1.bf16.msra.mxu1 %v1276_v43  ;;  %v117_v43 = vrot.slane %v1615_v32, 3 }
  0x48   :  { %967 = vmatpush1.bf16.msra.mxu0 %v1279_v54  ;;  %862 = vmatprep.subr.bf16.mxu1 %v1284_v59  ;;  %v1338_v54 = vld [vmem:[%s1830_s1 + $0x1e4] ss:$8 sps:$4 sm:$0xff]   ;;  %v80_v59 = vrot.slane %v78_v39, 1 }
  0x49   :  { %968 = vmatprep.subr.bf16.mxu0 %v1287_v58  ;;  %v118_v46 = vsel %vm112_vm5, %v116_v42, %v117_v43  ;;  %v81_v58 = vrot.slane %v1631_v38, 2 }
  0x4a   :  { %848 = vmatmul.mubr.bf16.gmra.mrb[4].mxu1 %v1613_v31  ;;  %v1327_v31 = vld [vmem:[%s1830_s1 + $0x1b0] ss:$8 sps:$4 sm:$0xff]  }
  0x4b   :  { %954 = vmatmul.mubr.bf16.gmra.mrb[4].mxu0 %v92_v4  ;;  %863 = vmatpush1.bf16.msra.mxu1 %v1282_v2  ;;  %v82_v63 = vor.u32 %v81_v58, %v80_v59  ;;  %v235_v4 = vlaneseq }
  0x4c   :  { %969 = vmatpush1.bf16.msra.mxu0 %v1285_v3  ;;  %864 = vmatprep.subr.bf16.mxu1 %v1290_v6 }
  0x4d   :  { %970 = vmatprep.subr.bf16.mxu0 %v1293_v7  ;;  %996 = vmatprep.mubr.bf16.mxu0 %v1342_v15  ;;  %v83_v0 = vsel %vm65_vm4, %v77_v62, %v82_v63  ;;  %v236_v5 = vshrl.u32 %v235_v4, 7  ;;  %v233_v7 = vld [vmem:[%s1832_s2] sm:$0x3] }
  0x4e   :  { %890 = vmatprep.mubr.bf16.mxu1 %v74_v9 }
  0x4f   :  { %865 = vmatpush1.bf16.msra.mxu1 %v1288_v11  ;;  %v237_v6 = vsub.s32 0, %v236_v5  ;;  %v241_v8 = vsub.s32 1, %v236_v5 }
  0x50   :  { %971 = vmatpush1.bf16.msra.mxu0 %v1291_v12  ;;  %866 = vmatprep.subr.bf16.mxu1 %v1296_v13 }
  0x51   :  { %972 = vmatprep.subr.bf16.mxu0 %v1299_v14  ;;  %v242_v9 = vrot.slane %v233_v7, %v241_v8 }
  0x53   :  { %867 = vmatpush1.bf16.msra.mxu1 %v1294_v16 }
  0x54   :  { %973 = vmatpush1.bf16.msra.mxu0 %v1297_v17  ;;  %868 = vmatprep.subr.bf16.mxu1 %v1302_v18 }
  0x55   :  { %974 = vmatprep.subr.bf16.mxu0 %v1305_v20 }
  0x57   :  { %869 = vmatpush1.bf16.msra.mxu1 %v1300_v21 }
  0x58   :  { %975 = vmatpush1.bf16.msra.mxu0 %v1303_v22  ;;  %870 = vmatprep.subr.bf16.mxu1 %v1308_v23 }
  0x59   :  { %976 = vmatprep.subr.bf16.mxu0 %v1311_v24 }
  0x5b   :  { %871 = vmatpush1.bf16.msra.mxu1 %v1306_v25 }
  0x5c   :  { %977 = vmatpush1.bf16.msra.mxu0 %v1309_v26  ;;  %872 = vmatprep.subr.bf16.mxu1 %v1314_v27 }
  0x5d   :  { %978 = vmatprep.subr.bf16.mxu0 %v1317_v28 }
  0x5f   :  { %873 = vmatpush1.bf16.msra.mxu1 %v1312_v29 }
  0x60   :  { %979 = vmatpush1.bf16.msra.mxu0 %v1315_v30  ;;  %874 = vmatprep.subr.bf16.mxu1 %v1320_v35 }
  0x63   :  { %997 = vmatmul.mubr.bf16.vlgmr.msra.gmra.mrb[0].mxu0 %v115_v41  ;;  %875 = vmatpush1.bf16.msra.mxu1 %v1318_v40 }
  0x64   :  { %1006 = vmatprep.mubr.bf16.mxu0 %v1342_v15  ;;  %876 = vmatprep.subr.bf16.mxu1 %v1323_v52 }
  0x67   :  { %877 = vmatpush1.bf16.msra.mxu1 %v1321_v53 }
  0x68   :  { %878 = vmatprep.subr.bf16.mxu1 %v1326_v44 }
  0x6b   :  { %1007 = vmatmul.mubr.bf16.gmra.mrb[4].mxu0 %v118_v46  ;;  %879 = vmatpush1.bf16.msra.mxu1 %v1324_v45 }
  0x6c   :  { %880 = vmatprep.subr.bf16.mxu1 %v1329_v47 }
  0x6f   :  { %881 = vmatpush1.bf16.msra.mxu1 %v1327_v31 }
  0x70   :  { %882 = vmatprep.subr.bf16.mxu1 %v1332_v48 }
  0x73   :  { %883 = vmatpush1.bf16.msra.mxu1 %v1330_v49 }
  0x74   :  { %884 = vmatprep.subr.bf16.mxu1 %v1335_v50 }
  0x77   :  { %885 = vmatpush1.bf16.msra.mxu1 %v1333_v51 }
  0x78   :  { %886 = vmatprep.subr.bf16.mxu1 %v1338_v54 }
  0x7b   :  { %887 = vmatpush1.bf16.msra.mxu1 %v1336_v55 }
  0x7c   :  { %888 = vmatprep.subr.bf16.mxu1 %v1341_v56 }
  0x7f   :  { %889 = vmatpush1.bf16.msra.mxu1 %v1339_v61 }
  0x82   :  { %891 = vmatmul.mubr.bf16.vlgmr.msra.gmra.mrb[0].mxu1 %v1582_v19  ;;  %v238_v19 = vrot.slane %v233_v7, %v237_v6 }
  0x83   :  { %900 = vmatprep.mubr.bf16.mxu1 %v83_v0 }
  0x8a   :  { %901 = vmatmul.mubr.bf16.gmra.mrb[4].mxu1 %v1685_v10 }
 0x136   :  { %v998_v32 = vpop.f32.mrb[0].mxu0 }
 0x137   :  { %v1000_v36 = vpop.f32.mrb[1].mxu0 }
 0x138   :  { %v1002_v37 = vpop.f32.mrb[2].mxu0 }
 0x139   :  { %v1004_v38 = vpop.f32.mrb[3].mxu0 }
 0x13e   :  { %v1008_v39 = vpop.f32.mrb[4].mxu0 }
 0x13f   :  { %v1010_v1 = vpop.f32.mrb[5].mxu0 }
 0x140   :  { %v1012_v2 = vpop.f32.mrb[6].mxu0 }
 0x141   :  { %v1014_v3 = vpop.f32.mrb[7].mxu0 }
 0x155   :  { %v892_v11 = vpop.f32.mrb[0].mxu1 }
 0x156   :  { %v1141_v10 = vadd.f32 %v892_v11, %v238_v19  ;;  %v894_v12 = vpop.f32.mrb[1].mxu1 }
 0x157   :  { %v1143_v13 = vadd.f32 %v894_v12, %v242_v9  ;;  %v896_v14 = vpop.f32.mrb[2].mxu1 }
 0x158   :  { %v1142_v15 = vadd.f32 %v1141_v10, %v998_v32  ;;  %v1145_v16 = vadd.f32 %v896_v14, %v238_v19  ;;  %v898_v17 = vpop.f32.mrb[3].mxu1 }
 0x159   :  { %v1144_v18 = vadd.f32 %v1143_v13, %v1000_v36  ;;  %v1147_v20 = vadd.f32 %v898_v17, %v242_v9 }
 0x15a   :  { %1017 = vst [vmem:[%s1833_s3] sm:$0xff] %v1142_v15  ;;  %v1146_v21 = vadd.f32 %v1145_v16, %v1002_v37 }
 0x15b   :  { %1018 = vst [vmem:[%s1833_s3 + $0x8] sm:$0xff] %v1144_v18  ;;  %v1148_v22 = vadd.f32 %v1147_v20, %v1004_v38 }
 0x15c   :  { %1019 = vst [vmem:[%s1833_s3 + $0x10] sm:$0xff] %v1146_v21 }
 0x15d   :  { %1020 = vst [vmem:[%s1833_s3 + $0x18] sm:$0xff] %v1148_v22  ;;  %v902_v23 = vpop.f32.mrb[4].mxu1 }
 0x15e   :  { %v1149_v24 = vadd.f32 %v902_v23, %v238_v19  ;;  %v904_v25 = vpop.f32.mrb[5].mxu1 }
 0x15f   :  { %v1151_v26 = vadd.f32 %v904_v25, %v242_v9  ;;  %v906_v27 = vpop.f32.mrb[6].mxu1 }
 0x160   :  { %v1150_v28 = vadd.f32 %v1149_v24, %v1008_v39  ;;  %v1153_v29 = vadd.f32 %v906_v27, %v238_v19  ;;  %v908_v30 = vpop.f32.mrb[7].mxu1 }
 0x161   :  { %v1152_v33 = vadd.f32 %v1151_v26, %v1010_v1  ;;  %v1155_v34 = vadd.f32 %v908_v30, %v242_v9 }
 0x162   :  { %1021 = vst [vmem:[%s1833_s3 + $0x20] sm:$0xff] %v1150_v28  ;;  %v1154_v35 = vadd.f32 %v1153_v29, %v1012_v2 }
 0x163   :  { %1022 = vst [vmem:[%s1833_s3 + $0x28] sm:$0xff] %v1152_v33  ;;  %v1156_v40 = vadd.f32 %v1155_v34, %v1014_v3 }
 0x164   :  { %1023 = vst [vmem:[%s1833_s3 + $0x30] sm:$0xff] %v1154_v35 }
 0x165   :  { %1024 = vst [vmem:[%s1833_s3 + $0x38] sm:$0xff] %v1156_v40 }

</bundles_post_ra>
